<compile_context>
chip_gen: v7x
topology: tpu7x:2x2x1
jax: 0.10.0
libtpu: 0.0.40
codegen_flags: <defaults>
</compile_context>

<pallas_src>
import jax
import jax.numpy as jnp
from jax.experimental import pallas as pl
from jax.experimental.pallas import tpu as pltpu


def _round_up(a, b):
    return (a + b - 1) // b * b


def relu_conv_bn(x, weight, gamma, beta, running_mean, running_var, *,
                 stride=1, padding=1, eps=1e-5, compute_dtype=None):
    """Pallas forward of SS-DARTS ReLUConvBN (eval-mode BN).

    x:      (N, C_in, H, W)        NCHW, like PyTorch
    weight: (C_out, C_in, KH, KW)  PyTorch Conv2d (OIHW), bias=False
    gamma, beta, running_mean, running_var: (C_out,)
    compute_dtype: streaming dtype for activations/weights (e.g. jnp.bfloat16
                   on v6e/v7x).  Accumulation is always f32.
    """
    n, c_in, h, w_in = x.shape
    c_out, c_in_w, kh, kw = weight.shape
    assert c_in == c_in_w, "channel mismatch"
    s = int(stride)
    p = int(padding)

    hp, wp = h + 2 * p, w_in + 2 * p
    ho = (hp - kh) // s + 1
    wo = (wp - kw) // s + 1
    hp_r, wp_r = _round_up(hp, s), _round_up(wp, s)     # pad to stride multiple
    hq, wq = hp_r // s, wp_r // s                       # per-phase spatial dims
    macc = ho * wq                                      # kernel output width (lane dim)
    max_shift = ((kh - 1) // s) * wq + (kw - 1) // s
    mstore = _round_up(max(hq * wq, macc + max_shift), 128)
    n_phase = s * s
    n_tap = kh * kw

    cdt = jnp.dtype(compute_dtype) if compute_dtype is not None else x.dtype

    # ---- single fused pass over the input: ReLU -> pad -> phase-split -> flatten
    # (ReLU before pad is exact since ReLU(0)=0; ReLU before any bf16 downcast.)
    xr = jnp.maximum(x, jnp.zeros((), x.dtype))
    x_pad = jnp.pad(xr, ((0, 0), (0, 0),
                         (p, hp_r - h - p), (p, wp_r - w_in - p)))
    # phase[a,b][n,ci,r,c] = x_pad[n,ci, s*r+a, s*c+b]
    xph = x_pad.reshape(n, c_in, hq, s, wq, s).transpose(0, 3, 5, 1, 2, 4)
    xflat = xph.reshape(n, n_phase, c_in, hq * wq)
    xflat = jnp.pad(xflat, ((0, 0), (0, 0), (0, 0), (0, mstore - hq * wq)))
    xflat = xflat.astype(cdt)

    # ---- fold eval-mode BN scale into the weight; bias added in the kernel
    inv_std = jax.lax.rsqrt(running_var.astype(jnp.float32) + eps)
    scale = gamma.astype(jnp.float32) * inv_std                      # (C_out,)
    bias = (beta.astype(jnp.float32)
            - running_mean.astype(jnp.float32) * scale).reshape(c_out, 1)
    w_taps = weight.astype(jnp.float32) * scale[:, None, None, None]
    w_taps = w_taps.transpose(2, 3, 0, 1).reshape(n_tap, c_out, c_in).astype(cdt)

    # ---- kernel: per batch element, K*K shifted slices -> MXU dots -> +bias
    def kernel(w_ref, b_ref, x_ref, o_ref):
        # w_ref: (n_tap, C_out, C_in)   BN-scaled conv weight
        # b_ref: (C_out, 1)             folded BN bias (f32)
        # x_ref: (n_phase, C_in, mstore)  flattened phase images for this n
        # o_ref: (C_out, macc)          lane-dense output (cols >= Wo are garbage)
        acc = jnp.zeros((c_out, macc), jnp.float32)
        for i in range(kh):
            for j in range(kw):
                t = i * kw + j
                phase = (i % s) * s + (j % s)
                shift = (i // s) * wq + (j // s)
                rhs = x_ref[phase, :, shift:shift + macc]       # (C_in, macc)
                acc = acc + jnp.dot(w_ref[t], rhs,
                                    preferred_element_type=jnp.float32)
        o_ref[...] = (acc + b_ref[...]).astype(o_ref.dtype)

    bytes_x = n * n_phase * c_in * mstore * xflat.dtype.itemsize
    bytes_w = n_tap * c_out * c_in * w_taps.dtype.itemsize + c_out * 1 * 4
    bytes_o = n * c_out * macc * jnp.dtype(x.dtype).itemsize
    cost = pl.CostEstimate(flops=2 * n * c_out * c_in * n_tap * macc,
                           transcendentals=0,
                           bytes_accessed=bytes_x + bytes_w + bytes_o)

    out_flat = pl.pallas_call(
        kernel,
        out_shape=jax.ShapeDtypeStruct((n, c_out, macc), x.dtype),
        grid=(n,),
        in_specs=[
            pl.BlockSpec((n_tap, c_out, c_in), lambda b: (0, 0, 0)),   # weight (reused)
            pl.BlockSpec((c_out, 1), lambda b: (0, 0)),                # BN bias
            pl.BlockSpec((None, n_phase, c_in, mstore),                # per-n input
                         lambda b: (b, 0, 0, 0)),
        ],
        out_specs=pl.BlockSpec((None, c_out, macc), lambda b: (b, 0, 0)),
        compiler_params=pltpu.CompilerParams(
            dimension_semantics=("parallel",)),
        cost_estimate=cost,
    )(w_taps, bias, xflat)

    # (N, C_out, Ho*Wq) -> (N, C_out, Ho, Wq) -> crop garbage cols -> NCHW.
    return out_flat.reshape(n, c_out, ho, wq)[:, :, :, :wo]


def _reference(x, weight, gamma, beta, running_mean, running_var,
               stride, padding, eps=1e-5):
    """Pure-JAX reference matching PyTorch ReLUConvBN (eval-mode BN)."""
    xr = jnp.maximum(x, 0.0)
    y = jax.lax.conv_general_dilated(
        xr, weight,
        window_strides=(stride, stride),
        padding=((padding, padding), (padding, padding)),
        dimension_numbers=("NCHW", "OIHW", "NCHW"),
        precision=jax.lax.Precision.HIGHEST)
    scale = gamma / jnp.sqrt(running_var + eps)
    bias = beta - running_mean * scale
    return y * scale[None, :, None, None] + bias[None, :, None, None]


if __name__ == "__main__":
    key = jax.random.PRNGKey(0)
    k_x, k_w3, k_w1 = jax.random.split(key, 3)

    # Small shapes consistent with the module: N=2, C_in=4, C_out=8, 16x16.
    x = jax.random.normal(k_x, (2, 4, 16, 16), dtype=jnp.float32)
    w3 = jax.random.normal(k_w3, (8, 4, 3, 3), dtype=jnp.float32) * 0.1
    w1 = jax.random.normal(k_w1, (8, 4, 1, 1), dtype=jnp.float32) * 0.1

    c_out = 8
    gamma = 1.0 + 0.1 * jnp.arange(c_out, dtype=jnp.float32)
    beta = 0.05 * jnp.arange(c_out, dtype=jnp.float32)
    running_mean = 0.01 * jnp.arange(c_out, dtype=jnp.float32)
    running_var = 1.0 + 0.1 * jnp.arange(c_out, dtype=jnp.float32)

    cases = [
        (w3, 1, 1),   # 3x3, stride 1, pad 1
        (w3, 2, 1),   # 3x3, stride 2, pad 1
        (w1, 1, 0),   # 1x1, stride 1, pad 0 (canonical DARTS ReLUConvBN)
    ]

    ok = True
    for w_conv, stride, padding in cases:
        y = relu_conv_bn(x, w_conv, gamma, beta, running_mean, running_var,
                         stride=stride, padding=padding)
        y = jax.block_until_ready(y)
        y_ref = jax.block_until_ready(
            _reference(x, w_conv, gamma, beta, running_mean, running_var,
                       stride, padding))
        assert y.shape == y_ref.shape, (y.shape, y_ref.shape)
        err = float(jnp.max(jnp.abs(y - y_ref)))
        if not bool(jnp.allclose(y, y_ref, rtol=1e-4, atol=1e-4)):
            ok = False
            print(f"MISMATCH k={w_conv.shape[2]} stride={stride} "
                  f"padding={padding} max_abs_err={err}")

    if ok:
        print("KERNEL_OK")
</pallas_src>

<mosaic_0001>
module attributes {stable_mosaic.version = 11 : i64} {
  func.func @kernel(%arg0: i32, %arg1: memref<9x8x4xf32, #tpu.memory_space<vmem>>, %arg2: memref<8x1xf32, #tpu.memory_space<vmem>>, %arg3: memref<1x1x4x384xf32, #tpu.memory_space<vmem>>, %arg4: memref<1x8x288xf32, #tpu.memory_space<vmem>>) attributes {dimension_semantics = [#tpu.dimension_semantics<parallel>], iteration_bounds = array<i64: 2>, scalar_prefetch = 0 : i64, scratch_operands = 0 : i64, tpu.core_type = #tpu.core_type<tc>, window_params = [{pipeline_mode = #tpu.pipeline_mode<synchronous>, transform_indices = @transform_0, window_bounds = array<i64: 9, 8, 4>}, {pipeline_mode = #tpu.pipeline_mode<synchronous>, transform_indices = @transform_1, window_bounds = array<i64: 8, 1>}, {transform_indices = @transform_2, window_bounds = array<i64: 1, 1, 4, 384>}, {transform_indices = @transform_3, window_bounds = array<i64: 1, 8, 288>}]} {
    %cst = arith.constant 0.000000e+00 : f32
    %0 = vector.broadcast %cst : f32 to vector<8x288xf32>
    %c0 = arith.constant 0 : index
    %c0_0 = arith.constant 0 : index
    %c0_1 = arith.constant 0 : index
    %c0_2 = arith.constant 0 : index
    %1 = vector.load %arg3[%c0, %c0_0, %c0_1, %c0_2] : memref<1x1x4x384xf32, #tpu.memory_space<vmem>>, vector<1x1x4x288xf32>
    %2 = vector.shape_cast %1 : vector<1x1x4x288xf32> to vector<4x288xf32>
    %c0_3 = arith.constant 0 : index
    %c0_4 = arith.constant 0 : index
    %c0_5 = arith.constant 0 : index
    %3 = vector.load %arg1[%c0_3, %c0_4, %c0_5] : memref<9x8x4xf32, #tpu.memory_space<vmem>>, vector<1x8x4xf32>
    %4 = vector.shape_cast %3 : vector<1x8x4xf32> to vector<8x4xf32>
    %cst_6 = arith.constant dense<0.000000e+00> : vector<8x288xf32>
    %5 = tpu.matmul %4, %2, %cst_6 {dimension_numbers = #tpu.dot_dimension_numbers<[1], [0], [0], [1], [0, 0, 1, 1], [], []>} : vector<8x4xf32>, vector<4x288xf32>, vector<8x288xf32> -> vector<8x288xf32>
    %6 = arith.addf %0, %5 : vector<8x288xf32>
    %c0_7 = arith.constant 0 : index
    %c0_8 = arith.constant 0 : index
    %c0_9 = arith.constant 0 : index
    %c1 = arith.constant 1 : index
    %7 = vector.load %arg3[%c0_7, %c0_8, %c0_9, %c1] : memref<1x1x4x384xf32, #tpu.memory_space<vmem>>, vector<1x1x4x288xf32>
    %8 = vector.shape_cast %7 : vector<1x1x4x288xf32> to vector<4x288xf32>
    %c1_10 = arith.constant 1 : index
    %c0_11 = arith.constant 0 : index
    %c0_12 = arith.constant 0 : index
    %9 = vector.load %arg1[%c1_10, %c0_11, %c0_12] : memref<9x8x4xf32, #tpu.memory_space<vmem>>, vector<1x8x4xf32>
    %10 = vector.shape_cast %9 : vector<1x8x4xf32> to vector<8x4xf32>
    %cst_13 = arith.constant dense<0.000000e+00> : vector<8x288xf32>
    %11 = tpu.matmul %10, %8, %cst_13 {dimension_numbers = #tpu.dot_dimension_numbers<[1], [0], [0], [1], [0, 0, 1, 1], [], []>} : vector<8x4xf32>, vector<4x288xf32>, vector<8x288xf32> -> vector<8x288xf32>
    %12 = arith.addf %6, %11 : vector<8x288xf32>
    %c0_14 = arith.constant 0 : index
    %c0_15 = arith.constant 0 : index
    %c0_16 = arith.constant 0 : index
    %c2 = arith.constant 2 : index
    %13 = vector.load %arg3[%c0_14, %c0_15, %c0_16, %c2] : memref<1x1x4x384xf32, #tpu.memory_space<vmem>>, vector<1x1x4x288xf32>
    %14 = vector.shape_cast %13 : vector<1x1x4x288xf32> to vector<4x288xf32>
    %c2_17 = arith.constant 2 : index
    %c0_18 = arith.constant 0 : index
    %c0_19 = arith.constant 0 : index
    %15 = vector.load %arg1[%c2_17, %c0_18, %c0_19] : memref<9x8x4xf32, #tpu.memory_space<vmem>>, vector<1x8x4xf32>
    %16 = vector.shape_cast %15 : vector<1x8x4xf32> to vector<8x4xf32>
    %cst_20 = arith.constant dense<0.000000e+00> : vector<8x288xf32>
    %17 = tpu.matmul %16, %14, %cst_20 {dimension_numbers = #tpu.dot_dimension_numbers<[1], [0], [0], [1], [0, 0, 1, 1], [], []>} : vector<8x4xf32>, vector<4x288xf32>, vector<8x288xf32> -> vector<8x288xf32>
    %18 = arith.addf %12, %17 : vector<8x288xf32>
    %c0_21 = arith.constant 0 : index
    %c0_22 = arith.constant 0 : index
    %c0_23 = arith.constant 0 : index
    %c18 = arith.constant 18 : index
    %19 = vector.load %arg3[%c0_21, %c0_22, %c0_23, %c18] : memref<1x1x4x384xf32, #tpu.memory_space<vmem>>, vector<1x1x4x288xf32>
    %20 = vector.shape_cast %19 : vector<1x1x4x288xf32> to vector<4x288xf32>
    %c3 = arith.constant 3 : index
    %c0_24 = arith.constant 0 : index
    %c0_25 = arith.constant 0 : index
    %21 = vector.load %arg1[%c3, %c0_24, %c0_25] : memref<9x8x4xf32, #tpu.memory_space<vmem>>, vector<1x8x4xf32>
    %22 = vector.shape_cast %21 : vector<1x8x4xf32> to vector<8x4xf32>
    %cst_26 = arith.constant dense<0.000000e+00> : vector<8x288xf32>
    %23 = tpu.matmul %22, %20, %cst_26 {dimension_numbers = #tpu.dot_dimension_numbers<[1], [0], [0], [1], [0, 0, 1, 1], [], []>} : vector<8x4xf32>, vector<4x288xf32>, vector<8x288xf32> -> vector<8x288xf32>
    %24 = arith.addf %18, %23 : vector<8x288xf32>
    %c0_27 = arith.constant 0 : index
    %c0_28 = arith.constant 0 : index
    %c0_29 = arith.constant 0 : index
    %c19 = arith.constant 19 : index
    %25 = vector.load %arg3[%c0_27, %c0_28, %c0_29, %c19] : memref<1x1x4x384xf32, #tpu.memory_space<vmem>>, vector<1x1x4x288xf32>
    %26 = vector.shape_cast %25 : vector<1x1x4x288xf32> to vector<4x288xf32>
    %c4 = arith.constant 4 : index
    %c0_30 = arith.constant 0 : index
    %c0_31 = arith.constant 0 : index
    %27 = vector.load %arg1[%c4, %c0_30, %c0_31] : memref<9x8x4xf32, #tpu.memory_space<vmem>>, vector<1x8x4xf32>
    %28 = vector.shape_cast %27 : vector<1x8x4xf32> to vector<8x4xf32>
    %cst_32 = arith.constant dense<0.000000e+00> : vector<8x288xf32>
    %29 = tpu.matmul %28, %26, %cst_32 {dimension_numbers = #tpu.dot_dimension_numbers<[1], [0], [0], [1], [0, 0, 1, 1], [], []>} : vector<8x4xf32>, vector<4x288xf32>, vector<8x288xf32> -> vector<8x288xf32>
    %30 = arith.addf %24, %29 : vector<8x288xf32>
    %c0_33 = arith.constant 0 : index
    %c0_34 = arith.constant 0 : index
    %c0_35 = arith.constant 0 : index
    %c20 = arith.constant 20 : index
    %31 = vector.load %arg3[%c0_33, %c0_34, %c0_35, %c20] : memref<1x1x4x384xf32, #tpu.memory_space<vmem>>, vector<1x1x4x288xf32>
    %32 = vector.shape_cast %31 : vector<1x1x4x288xf32> to vector<4x288xf32>
    %c5 = arith.constant 5 : index
    %c0_36 = arith.constant 0 : index
    %c0_37 = arith.constant 0 : index
    %33 = vector.load %arg1[%c5, %c0_36, %c0_37] : memref<9x8x4xf32, #tpu.memory_space<vmem>>, vector<1x8x4xf32>
    %34 = vector.shape_cast %33 : vector<1x8x4xf32> to vector<8x4xf32>
    %cst_38 = arith.constant dense<0.000000e+00> : vector<8x288xf32>
    %35 = tpu.matmul %34, %32, %cst_38 {dimension_numbers = #tpu.dot_dimension_numbers<[1], [0], [0], [1], [0, 0, 1, 1], [], []>} : vector<8x4xf32>, vector<4x288xf32>, vector<8x288xf32> -> vector<8x288xf32>
    %36 = arith.addf %30, %35 : vector<8x288xf32>
    %c0_39 = arith.constant 0 : index
    %c0_40 = arith.constant 0 : index
    %c0_41 = arith.constant 0 : index
    %c36 = arith.constant 36 : index
    %37 = vector.load %arg3[%c0_39, %c0_40, %c0_41, %c36] : memref<1x1x4x384xf32, #tpu.memory_space<vmem>>, vector<1x1x4x288xf32>
    %38 = vector.shape_cast %37 : vector<1x1x4x288xf32> to vector<4x288xf32>
    %c6 = arith.constant 6 : index
    %c0_42 = arith.constant 0 : index
    %c0_43 = arith.constant 0 : index
    %39 = vector.load %arg1[%c6, %c0_42, %c0_43] : memref<9x8x4xf32, #tpu.memory_space<vmem>>, vector<1x8x4xf32>
    %40 = vector.shape_cast %39 : vector<1x8x4xf32> to vector<8x4xf32>
    %cst_44 = arith.constant dense<0.000000e+00> : vector<8x288xf32>
    %41 = tpu.matmul %40, %38, %cst_44 {dimension_numbers = #tpu.dot_dimension_numbers<[1], [0], [0], [1], [0, 0, 1, 1], [], []>} : vector<8x4xf32>, vector<4x288xf32>, vector<8x288xf32> -> vector<8x288xf32>
    %42 = arith.addf %36, %41 : vector<8x288xf32>
    %c0_45 = arith.constant 0 : index
    %c0_46 = arith.constant 0 : index
    %c0_47 = arith.constant 0 : index
    %c37 = arith.constant 37 : index
    %43 = vector.load %arg3[%c0_45, %c0_46, %c0_47, %c37] : memref<1x1x4x384xf32, #tpu.memory_space<vmem>>, vector<1x1x4x288xf32>
    %44 = vector.shape_cast %43 : vector<1x1x4x288xf32> to vector<4x288xf32>
    %c7 = arith.constant 7 : index
    %c0_48 = arith.constant 0 : index
    %c0_49 = arith.constant 0 : index
    %45 = vector.load %arg1[%c7, %c0_48, %c0_49] : memref<9x8x4xf32, #tpu.memory_space<vmem>>, vector<1x8x4xf32>
    %46 = vector.shape_cast %45 : vector<1x8x4xf32> to vector<8x4xf32>
    %cst_50 = arith.constant dense<0.000000e+00> : vector<8x288xf32>
    %47 = tpu.matmul %46, %44, %cst_50 {dimension_numbers = #tpu.dot_dimension_numbers<[1], [0], [0], [1], [0, 0, 1, 1], [], []>} : vector<8x4xf32>, vector<4x288xf32>, vector<8x288xf32> -> vector<8x288xf32>
    %48 = arith.addf %42, %47 : vector<8x288xf32>
    %c0_51 = arith.constant 0 : index
    %c0_52 = arith.constant 0 : index
    %c0_53 = arith.constant 0 : index
    %c38 = arith.constant 38 : index
    %49 = vector.load %arg3[%c0_51, %c0_52, %c0_53, %c38] : memref<1x1x4x384xf32, #tpu.memory_space<vmem>>, vector<1x1x4x288xf32>
    %50 = vector.shape_cast %49 : vector<1x1x4x288xf32> to vector<4x288xf32>
    %c8 = arith.constant 8 : index
    %c0_54 = arith.constant 0 : index
    %c0_55 = arith.constant 0 : index
    %51 = vector.load %arg1[%c8, %c0_54, %c0_55] : memref<9x8x4xf32, #tpu.memory_space<vmem>>, vector<1x8x4xf32>
    %52 = vector.shape_cast %51 : vector<1x8x4xf32> to vector<8x4xf32>
    %cst_56 = arith.constant dense<0.000000e+00> : vector<8x288xf32>
    %53 = tpu.matmul %52, %50, %cst_56 {dimension_numbers = #tpu.dot_dimension_numbers<[1], [0], [0], [1], [0, 0, 1, 1], [], []>} : vector<8x4xf32>, vector<4x288xf32>, vector<8x288xf32> -> vector<8x288xf32>
    %54 = arith.addf %48, %53 : vector<8x288xf32>
    %c0_57 = arith.constant 0 : index
    %c0_58 = arith.constant 0 : index
    %55 = vector.load %arg2[%c0_57, %c0_58] : memref<8x1xf32, #tpu.memory_space<vmem>>, vector<8x1xf32>
    %56 = vector.broadcast %55 : vector<8x1xf32> to vector<8x288xf32>
    %57 = arith.addf %54, %56 : vector<8x288xf32>
    %c0_59 = arith.constant 0 : index
    %c0_60 = arith.constant 0 : index
    %c0_61 = arith.constant 0 : index
    %58 = vector.load %arg4[%c0_59, %c0_60, %c0_61] : memref<1x8x288xf32, #tpu.memory_space<vmem>>, vector<1x8x288xf32>
    %59 = vector.shape_cast %58 : vector<1x8x288xf32> to vector<8x288xf32>
    %60 = vector.shape_cast %57 : vector<8x288xf32> to vector<1x8x288xf32>
    tpu.vector_store %arg4[%c0_59, %c0_60, %c0_61], %60 {strides = array<i32>} : memref<1x8x288xf32, #tpu.memory_space<vmem>>, vector<1x8x288xf32>,
    return
  }
  func.func @transform_0(%arg0: i32) -> (i32, i32, i32) {
    %c0_i32 = arith.constant 0 : i32
    %c0_i32_0 = arith.constant 0 : i32
    %c0_i32_1 = arith.constant 0 : i32
    %c0_i32_2 = arith.constant 0 : i32
    return %c0_i32, %c0_i32_0, %c0_i32_1 : i32, i32, i32
  }
  func.func @transform_1(%arg0: i32) -> (i32, i32) {
    %c0_i32 = arith.constant 0 : i32
    %c0_i32_0 = arith.constant 0 : i32
    %c0_i32_1 = arith.constant 0 : i32
    return %c0_i32, %c0_i32_0 : i32, i32
  }
  func.func @transform_2(%arg0: i32) -> (i32, i32, i32, i32) {
    %c0_i32 = arith.constant 0 : i32
    %c0_i32_0 = arith.constant 0 : i32
    %c0_i32_1 = arith.constant 0 : i32
    %c0_i32_2 = arith.constant 0 : i32
    return %arg0, %c0_i32, %c0_i32_0, %c0_i32_1 : i32, i32, i32, i32
  }
  func.func @transform_3(%arg0: i32) -> (i32, i32, i32) {
    %c0_i32 = arith.constant 0 : i32
    %c0_i32_0 = arith.constant 0 : i32
    %c0_i32_1 = arith.constant 0 : i32
    return %arg0, %c0_i32, %c0_i32_0 : i32, i32, i32
  }
}

</mosaic_0001>

<bundles_post_ra>
// kernel: tpu_custom_call.1
= control target key start
LH: loop header
LB: loop body
LE: loop exit
PB: predicated region body
PF: predicated region fallthrough
CT: control target
= control target key end

     0   :  { %8 = vsyncpa [#allocation3], 0  ;;  %s2298_s0 = inlined_call_operand.vmem [shape: f32[9,8,4], index: 0, kind: input, shape index: {}]   ;;  %s2299_s1 = inlined_call_operand.vmem [shape: f32[8,1], index: 1, kind: input, shape index: {}]   ;;  %s2300_s2 = inlined_call_operand.vmem [shape: f32[2,1,4,384], index: 2, kind: input, shape index: {}]   ;;  %s2301_s3 = inlined_call_operand.hbm [shape: f32[2,8,288], index: 3, kind: output, shape index: {}]  }
   0x1   :  { %10 = vsyncpa [#allocation3 + $0x1], 0  ;;  %s2049_s12 = smov 0   ;;  %s2051_s13 = smov 0  }
   0x2   :  { %s2053_s14 = smov 0   ;;  %s2055_s15 = smov 0  }
   0x3 LB: > { %s2070_s16 = sadd.s32 4294967295, %s2015_s15   ;;  %s1758_s17 = sadd.s32 4294967294, %s2015_s15   ;;  %s2015_s15 = sphi %s2055_s15, %s2307_s15   ;;  %s2011_s14 = sphi %s2053_s14, %s2306_s14   ;;  %s2007_s13 = sphi %s2051_s13, %s2305_s13   ;;  %s2003_s12 = sphi %s2049_s12, %s2304_s12  }
   0x4   : > { %s2074_s18 = sadd.s32 1, %s2015_s15   ;;  %s91_s19 = sadd.s32 1, %s2011_s14 }
   0x5   : > { %s88_s20 = ssub.s32 %s2015_s15, %s2074_s18  ;;  %p101_p0 = scmp.ne.s32.totalorder %s2011_s14, %s2007_s13 }
   0x6   : > { %p89_p1 = scmp.eq.s32.totalorder %s88_s20, 0  ;;  %p102_p2 = scmp.eq.s32.totalorder %s2070_s16, 1 }
   0x7   : > { %p107_p3 = scmp.ne.s32.totalorder %s2007_s13, %s2003_s12  ;;  %p108_p4 = scmp.eq.s32.totalorder %s1758_s17, 1 }
   0x8   : > { %s2085_s21 = scalar_select %p89_p1, %s2011_s14, %s91_s19  }
   0x9   : > { %p2087_p5 = por %p102_p2, %p101_p0  ;;  %p2091_p6 = por %p108_p4, %p107_p3 }
   0xa   : > { %p1761_p7 = scmp.ge.s32.totalorder %s2015_s15, 1  ;;  %p140_p8 = scmp.lt.s32.totalorder %s2015_s15, 3 }
   0xc   : > { %p141_p9 = pnand %p1761_p7, %p140_p8 }
   0xd   : > { %p164_p10 = scmp.lt.s32.totalorder (!%p141_p9), %s2070_s16, 1  ;;  %v2017_v0 = vmov (!%p141_p9), 0.0   ;;  %vm2018_vm0 = vmmov (!%p141_p9), 0   ;;  %s2019_s29 = smov (!%p141_p9), 127   ;;  %v1671_v11 = vld [vmem:[%s2299_s1] sm:$0xff] (!%p141_p9)  ;;  %v2027_v12 = vmov (!%p141_p9), 0  }
   0xe   : > { %144 = sbr.rel (%p141_p9) target bundleno = 444 (0x1bc), region = 32  ;;  %1837 = vmatprep.subr.mxu1 (!%p141_p9), %v2017_v0  ;;  %261 = vmatprep.mubr.f32.mxu0 (!%p141_p9), %v2017_v0  ;;  %s2020_s30 = smov (!%p141_p9), 126   ;;  %vm190_vm1 = vcmask (!%p141_p9), 1043456   ;;  %vm183_vm2 = vcmask (!%p141_p9), 1039360   ;;  %v1763_v18 = vld [vmem:[%s2298_s0 + $0x8] sm:$0xff] (!%p141_p9)  ;;  %vm186_vm3 = vcmask (!%p141_p9), 31744  }
   0xf   : > { %1839 = vmatprep.mubr.msk.f32.mxu1 (!%p141_p9), %vm2018_vm0, %v2017_v0  ;;  %s2021_s4 = smov (!%p141_p9), 110   ;;  %s2022_s5 = smov (!%p141_p9), 109   ;;  %1951 = vset.pattern.permute.xlu0 (!%p141_p9), %v2027_v12  ;;  %vm501_vm4 = vcmask (!%p141_p9), 1031168   ;;  %v171_v24 = vld [vmem:[%s2298_s0] sm:$0xff] (!%p141_p9)  ;;  %vm670_vm5 = vcmask (!%p141_p9), 900096   ;;  %v1774_v29 = vld [vmem:[%s2298_s0 + $0x10] sm:$0xff] (!%p141_p9) }
  0x10   : > { %s2023_s6 = smov (!%p141_p9), 108   ;;  %s2024_s7 = smov (!%p141_p9), 92   ;;  %v1780_v31 = vld [vmem:[%s2298_s0 + $0x18] sm:$0xff] (!%p141_p9)  ;;  %vm839_vm6 = vcmask (!%p141_p9), 891904   ;;  %v1786_v34 = vld [vmem:[%s2298_s0 + $0x20] sm:$0xff] (!%p141_p9)  ;;  %v1792_v39 = vld [vmem:[%s2298_s0 + $0x28] sm:$0xff] (!%p141_p9) }
  0x11   : > { %s2025_s8 = smov (!%p141_p9), 91   ;;  %s2026_s9 = smov (!%p141_p9), 90   ;;  %vm1008_vm7 = vcmask (!%p141_p9), 883712   ;;  %v1798_v46 = vld [vmem:[%s2298_s0 + $0x30] sm:$0xff] (!%p141_p9)  ;;  %vm1177_vm8 = vcmask (!%p141_p9), 752640   ;;  %v1804_v49 = vld [vmem:[%s2298_s0 + $0x38] sm:$0xff] (!%p141_p9) }
  0x12   : > { %v1810_v53 = vld [vmem:[%s2298_s0 + $0x40] sm:$0xff] (!%p141_p9)  ;;  %vm1346_vm9 = vcmask (!%p141_p9), 744448   ;;  %vm1515_vm10 = vcmask (!%p141_p9), 736256   ;;  %s161_s17 = sand.u32 (!%p141_p9), 1, %s2007_s13   ;;  %vm1682_vm11 = vcmask (!%p141_p9), 261120  }
  0x13   : > { %s1898_s19 = smul.u32 (!%p141_p9), 24, %s161_s17 }
  0x15   : > { %s165_s24 = scalar_select %p164_p10, %s2070_s16, 1 }
  0x16   : > { %s163_s20 = scalar_lea.vmem [#allocation2], %s1898_s19 }
  0x17   : > { %s1899_s25 = smul.u32 12, %s165_s24 }
  0x18   : > { %s1900_s24 = smul.u32 384, %s2070_s16  ;;  %s2028_s16 = smov [#allocation2]  }
  0x19   : > { %s2104_s28 = scalar_lea.vmem %s2300_s2, %s1899_s25  ;;  %s1699_s25 = sshll.u32 %s163_s20, 4  ;;  %s2258_s25 = int_to_ptr.vmem [resolvable:$true] %s1699_s25 }
  0x1a   : > { %v2109_v1 = vld [vmem:[%s2104_s28] sm:$0xff]  ;;  %v2115_v3 = vld [vmem:[%s2104_s28 + $0x8] sm:$0xf] }
  0x1b   : > { %177 = vrot.lane.b32.xlu1 %v2109_v1, %s2019_s29  ;;  %v176_v2 = vcombine.high %v2109_v1, %v2109_v1  ;;  %v489_v4 = vld [vmem:[%s2104_s28 + $0x8] sm:$0xf] }
  0x1c   : > { %v658_v5 = vld [vmem:[%s2104_s28 + $0x8] sm:$0xf] }
  0x1d   : > { %179 = vrot.lane.b32.xlu0 %v176_v2, %s2019_s29  ;;  %v827_v6 = vld [vmem:[%s2104_s28 + $0x8] sm:$0xf] }
  0x1e   : > { %v996_v7 = vld [vmem:[%s2104_s28 + $0x8] sm:$0xf] }
  0x1f   : > { %497 = vrot.lane.b32.xlu1 %v176_v2, %s2020_s30  ;;  %v1165_v8 = vld [vmem:[%s2104_s28 + $0x8] sm:$0xf] }
  0x20   : > { %v1334_v9 = vld [vmem:[%s2104_s28 + $0x8] sm:$0xf] }
  0x21   : > { %181 = vrot.lane.b32.xlu0 %v2115_v3, %s2019_s29  ;;  %v1503_v10 = vld [vmem:[%s2104_s28 + $0x8] sm:$0xf]  ;;  %s2256_s28 = scalar_lea.hbm %s2301_s3, %s1900_s24  ;;  %s1685_s29 = scalar_lea.sflag [#allocation3], %s161_s17 }
  0x23   : > { %495 = vrot.lane.b32.xlu1 %v2109_v1, %s2020_s30 }
  0x25   : > { %499 = vrot.lane.b32.xlu0 %v489_v4, %s2020_s30  ;;  %s1953_s30 = scalar_lea.vmem %s2258_s25, 384 }
  0x26   : > { %p1954_p11 = scmp.ne.s32.totalorder %s2258_s25, %s1953_s30 }
  0x27   : > { %668 = vrot.lane.b32.xlu1 %v658_v5, %s2021_s4 }
  0x28   : > { %p1955_p12 = pnand %p1954_p11, %p2087_p5 }
  0x29   : > { %666 = vrot.lane.b32.xlu0 %v176_v2, %s2021_s4 }
  0x2a   : > { %p1956_p13 = pneg %p1955_p12 }
  0x2b   : > { %835 = vrot.lane.b32.xlu1 %v176_v2, %s2022_s5 }
  0x2d   : > { %664 = vrot.lane.b32.xlu0 %v2109_v1, %s2021_s4  ;;  %s1957_s4 = sshll.u32 %s2028_s16, 4  ;;  %s1958_s4 = int_to_ptr.vmem [resolvable:$false] %s1957_s4 }
  0x2e   : > { %p1960_p0 = scmp.lt.s32.totalorder %s2258_s25, %s1958_s4 }
  0x2f   : > { %833 = vrot.lane.b32.xlu1 %v2109_v1, %s2022_s5 }
  0x31   : > { %837 = vrot.lane.b32.xlu0 %v827_v6, %s2022_s5  ;;  %s1959_s5 = scalar_lea.vmem %s1958_s4, 768 }
  0x32   : > { %p1961_p1 = scmp.lt.s32.totalorder %s1959_s5, %s1953_s30 }
  0x33   : > { %1006 = vrot.lane.b32.xlu1 %v996_v7, %s2023_s6 }
  0x34   : > { %p1962_p2 = por %p1961_p1, %p1960_p0 }
  0x35   : > { %1004 = vrot.lane.b32.xlu0 %v176_v2, %s2023_s6 }
  0x36   : > { %p1963_p3 = pnand %p1962_p2, %p1956_p13 }
  0x37   : > { %1173 = vrot.lane.b32.xlu1 %v176_v2, %s2024_s7 }
  0x39   : > { %1002 = vrot.lane.b32.xlu0 %v2109_v1, %s2023_s6 }
  0x3b   : > { %1171 = vrot.lane.b32.xlu1 %v2109_v1, %s2024_s7 }
  0x3d   : > { %1175 = vrot.lane.b32.xlu0 %v1165_v8, %s2024_s7 }
  0x3f   : > { %1344 = vrot.lane.b32.xlu1 %v1334_v9, %s2025_s8 }
  0x41   : > { %1342 = vrot.lane.b32.xlu0 %v176_v2, %s2025_s8 }
  0x43   : > { %1511 = vrot.lane.b32.xlu1 %v176_v2, %s2026_s9 }
  0x45   : > { %1340 = vrot.lane.b32.xlu0 %v2109_v1, %s2025_s8 }
  0x47   : > { %1509 = vrot.lane.b32.xlu1 %v2109_v1, %s2026_s9 }
  0x49   : > { %1513 = vrot.lane.b32.xlu0 %v1503_v10, %s2026_s9 }
  0x4d   : > { %1674 = vperm.xlu0 %1951, %v1671_v11  }
  0x8d   : > { %v178_v13 = vpop.permute.xlu1 %177 }
  0x8f   : > { %v180_v14 = vpop.permute.xlu0 %179 }
  0x90   : > { %v184_v19 = vsel %vm183_vm2, %v178_v13, %v180_v14 }
  0x91   : > { %v498_v15 = vpop.permute.xlu1 %497 }
  0x93   : > { %v182_v16 = vpop.permute.xlu0 %181 }
  0x94   : > { %1838 = vmatpush3.msk.msra.mxu1 %vm190_vm1, %v182_v16  ;;  %v185_v17 = vsel %vm183_vm2, %v180_v14, %v182_v16 }
  0x95   : > { %1764 = vmatprep.subr.msk.mxu0 %vm190_vm1, %v185_v17  ;;  %v496_v20 = vpop.permute.xlu1 %495  ;;  %1840 = vmatmul.mubr.msk.f32.vlgmr.msra.gmra.mrb[0].mxu1 %vm186_vm3, %v1763_v18 }
  0x96   : > { %1765 = vmatpush1.msk.msra.mxu0 %vm190_vm1, %v184_v19  ;;  %1842 = vmatprep.subr.mxu1 %v2017_v0  ;;  %v502_v26 = vsel %vm501_vm4, %v496_v20, %v498_v15 }
  0x97   : > { %1766 = vmatmul.mubr.msk.f32.vlgmr.msra.gmra.mrb[0].mxu0 %vm186_vm3, %v1763_v18  ;;  %1769 = vmatprep.subr.msk.mxu0 %vm190_vm1, %v176_v2  ;;  %v500_v21 = vpop.permute.xlu0 %499 }
  0x98   : > { %1770 = vmatpush1.msk.msra.mxu0 %vm190_vm1, %v2109_v1  ;;  %v503_v22 = vsel %vm501_vm4, %v498_v15, %v500_v21  ;;  %1843 = vmatpush3.msk.msra.mxu1 %vm190_vm1, %v2115_v3 }
  0x99   : > { %1775 = vmatprep.subr.msk.mxu0 %vm190_vm1, %v503_v22  ;;  %1844 = vmatprep.mubr.msk.f32.mxu1 %vm2018_vm0, %v2017_v0  ;;  %v669_v23 = vpop.permute.xlu1 %668 }
  0x9a   : > { %1847 = vmatprep.subr.mxu1 %v2017_v0  ;;  %411 = vmatprep.mubr.f32.mxu0 %v2017_v0 }
  0x9b   : > { %1845 = vmatmul.mubr.msk.f32.vlgmr.msra.gmra.mrb[2].mxu1 %vm186_vm3, %v171_v24  ;;  %v667_v25 = vpop.permute.xlu0 %666 }
  0x9c   : > { %1848 = vmatpush3.msk.msra.mxu1 %vm190_vm1, %v500_v21  ;;  %1849 = vmatprep.mubr.msk.f32.mxu1 %vm2018_vm0, %v2017_v0  ;;  %v672_v28 = vsel %vm670_vm5, %v667_v25, %v669_v23 }
  0x9d   : > { %1852 = vmatprep.subr.mxu1 %v2017_v0  ;;  %v836_v27 = vpop.permute.xlu1 %835 }
  0x9f   : > { %1771 = vmatmul.mubr.msk.f32.vlgmr.msra.gmra.mrb[0].mxu0 %vm186_vm3, %v171_v24  ;;  %v665_v30 = vpop.permute.xlu0 %664  ;;  %1850 = vmatmul.mubr.msk.f32.vlgmr.msra.gmra.mrb[4].mxu1 %vm186_vm3, %v1774_v29 }
  0xa0   : > { %1776 = vmatpush1.msk.msra.mxu0 %vm190_vm1, %v502_v26  ;;  %577 = vmatprep.mubr.f32.mxu0 %v2017_v0  ;;  %v671_v35 = vsel %vm670_vm5, %v665_v30, %v667_v25 }
  0xa1   : > { %1781 = vmatprep.subr.msk.mxu0 %vm190_vm1, %v672_v28  ;;  %1853 = vmatpush3.msk.msra.mxu1 %vm190_vm1, %v669_v23  ;;  %v834_v32 = vpop.permute.xlu1 %833 }
  0xa2   : > { %1854 = vmatprep.mubr.msk.f32.mxu1 %vm2018_vm0, %v2017_v0  ;;  %1857 = vmatprep.subr.mxu1 %v2017_v0  ;;  %v840_v42 = vsel %vm839_vm6, %v834_v32, %v836_v27 }
  0xa3   : > { %v838_v33 = vpop.permute.xlu0 %837  ;;  %1855 = vmatmul.mubr.msk.f32.vlgmr.msra.gmra.mrb[6].mxu1 %vm186_vm3, %v1780_v31 }
  0xa4   : > { %1858 = vmatpush3.msk.msra.mxu1 %vm190_vm1, %v838_v33  ;;  %1859 = vmatprep.mubr.msk.f32.mxu1 %vm2018_vm0, %v2017_v0  ;;  %v841_v37 = vsel %vm839_vm6, %v836_v27, %v838_v33 }
  0xa5   : > { %v1007_v36 = vpop.permute.xlu1 %1006  ;;  %1862 = vmatprep.subr.mxu1 %v2017_v0 }
  0xa7   : > { %1777 = vmatmul.mubr.msk.f32.vlgmr.msra.gmra.mrb[0].mxu0 %vm186_vm3, %v1774_v29  ;;  %v1005_v38 = vpop.permute.xlu0 %1004  ;;  %1860 = vmatmul.mubr.msk.f32.vlgmr.msra.gmra.mrb[8].mxu1 %vm186_vm3, %v1786_v34 }
  0xa8   : > { %1782 = vmatpush1.msk.msra.mxu0 %vm190_vm1, %v671_v35  ;;  %746 = vmatprep.mubr.f32.mxu0 %v2017_v0  ;;  %v1010_v44 = vsel %vm1008_vm7, %v1005_v38, %v1007_v36 }
  0xa9   : > { %1787 = vmatprep.subr.msk.mxu0 %vm190_vm1, %v841_v37  ;;  %v1174_v40 = vpop.permute.xlu1 %1173  ;;  %1863 = vmatpush3.msk.msra.mxu1 %vm190_vm1, %v1007_v36 }
  0xaa   : > { %1864 = vmatprep.mubr.msk.f32.mxu1 %vm2018_vm0, %v2017_v0  ;;  %1867 = vmatprep.subr.mxu1 %v2017_v0 }
  0xab   : > { %v1003_v41 = vpop.permute.xlu0 %1002  ;;  %1865 = vmatmul.mubr.msk.f32.vlgmr.msra.gmra.mrb[10].mxu1 %vm186_vm3, %v1792_v39 }
  0xac   : > { %1869 = vmatprep.mubr.msk.f32.mxu1 %vm2018_vm0, %v2017_v0  ;;  %v1009_v50 = vsel %vm1008_vm7, %v1003_v41, %v1005_v38 }
  0xad   : > { %v1172_v43 = vpop.permute.xlu1 %1171 }
  0xae   : > { %v1178_v55 = vsel %vm1177_vm8, %v1172_v43, %v1174_v40 }
  0xaf   : > { %1783 = vmatmul.mubr.msk.f32.vlgmr.msra.gmra.mrb[0].mxu0 %vm186_vm3, %v1780_v31  ;;  %v1176_v45 = vpop.permute.xlu0 %1175 }
  0xb0   : > { %1788 = vmatpush1.msk.msra.mxu0 %vm190_vm1, %v840_v42  ;;  %915 = vmatprep.mubr.f32.mxu0 %v2017_v0  ;;  %v1179_v51 = vsel %vm1177_vm8, %v1174_v40, %v1176_v45 }
  0xb1   : > { %1793 = vmatprep.subr.msk.mxu0 %vm190_vm1, %v1010_v44  ;;  %1868 = vmatpush3.msk.msra.mxu1 %vm190_vm1, %v1176_v45  ;;  %v1345_v47 = vpop.permute.xlu1 %1344 }
  0xb2   : > { %1870 = vmatmul.mubr.msk.f32.vlgmr.msra.gmra.mrb[12].mxu1 %vm186_vm3, %v1798_v46  ;;  %1872 = vmatprep.subr.mxu1 %v2017_v0 }
  0xb3   : > { %v1343_v48 = vpop.permute.xlu0 %1342  ;;  %1873 = vmatpush3.msk.msra.mxu1 %vm190_vm1, %v1345_v47  ;;  %1874 = vmatprep.mubr.msk.f32.mxu1 %vm2018_vm0, %v2017_v0 }
  0xb4   : > { %1877 = vmatprep.subr.mxu1 %v2017_v0  ;;  %v1348_v56 = vsel %vm1346_vm9, %v1343_v48, %v1345_v47 }
  0xb5   : > { %v1512_v57 = vpop.permute.xlu1 %1511 }
  0xb6   : > { %1875 = vmatmul.mubr.msk.f32.vlgmr.msra.gmra.mrb[14].mxu1 %vm186_vm3, %v1804_v49 }
  0xb7   : > { %1789 = vmatmul.mubr.msk.f32.vlgmr.msra.gmra.mrb[0].mxu0 %vm186_vm3, %v1786_v34  ;;  %v1341_v52 = vpop.permute.xlu0 %1340  ;;  %1879 = vmatprep.mubr.msk.f32.mxu1 %vm2018_vm0, %v2017_v0 }
  0xb8   : > { %1794 = vmatpush1.msk.msra.mxu0 %vm190_vm1, %v1009_v50  ;;  %1084 = vmatprep.mubr.f32.mxu0 %v2017_v0  ;;  %v1347_v58 = vsel %vm1346_vm9, %v1341_v52, %v1343_v48 }
  0xb9   : > { %1799 = vmatprep.subr.msk.mxu0 %vm190_vm1, %v1179_v51  ;;  %v1510_v60 = vpop.permute.xlu1 %1509 }
  0xba   : > { %v1516_v61 = vsel %vm1515_vm10, %v1510_v60, %v1512_v57 }
  0xbb   : > { %v1514_v54 = vpop.permute.xlu0 %1513 }
  0xbc   : > { %1878 = vmatpush3.msk.msra.mxu1 %vm190_vm1, %v1514_v54  ;;  %v1517_v59 = vsel %vm1515_vm10, %v1512_v57, %v1514_v54 }
  0xbd   : > { %1880 = vmatmul.mubr.msk.f32.vlgmr.msra.gmra.mrb[16].mxu1 %vm186_vm3, %v1810_v53 }
  0xbf   : > { %1795 = vmatmul.mubr.msk.f32.vlgmr.msra.gmra.mrb[0].mxu0 %vm186_vm3, %v1792_v39 }
  0xc0   : > { %1800 = vmatpush1.msk.msra.mxu0 %vm190_vm1, %v1178_v55  ;;  %1253 = vmatprep.mubr.f32.mxu0 %v2017_v0 }
  0xc1   : > { %1805 = vmatprep.subr.msk.mxu0 %vm190_vm1, %v1348_v56 }
  0xc7   : > { %1801 = vmatmul.mubr.msk.f32.vlgmr.msra.gmra.mrb[0].mxu0 %vm186_vm3, %v1798_v46 }
  0xc8   : > { %1806 = vmatpush1.msk.msra.mxu0 %vm190_vm1, %v1347_v58  ;;  %1422 = vmatprep.mubr.f32.mxu0 %v2017_v0 }
  0xc9   : > { %1811 = vmatprep.subr.msk.mxu0 %vm190_vm1, %v1517_v59 }
  0xcc   : > { %v1675_v22 = vpop.permute.xlu0 %1674 }
  0xcf   : > { %1807 = vmatmul.mubr.msk.f32.vlgmr.msra.gmra.mrb[0].mxu0 %vm186_vm3, %v1804_v49 }
  0xd0   : > { %1812 = vmatpush1.msk.msra.mxu0 %vm190_vm1, %v1516_v61  ;;  %1591 = vmatprep.mubr.f32.mxu0 %v2017_v0 }
  0xd7   : > { %1813 = vmatmul.mubr.msk.f32.vlgmr.msra.gmra.mrb[0].mxu0 %vm186_vm3, %v1810_v53 }
 0x168   : > { %v334_v62 = vpop.f32.mrb[0].mxu1 }
 0x169   : > { %v1841_v63 = vpop.f32.mrb[1].mxu1 }
 0x16e   : > { %v484_v1 = vpop.f32.mrb[2].mxu1 }
 0x16f   : > { %v485_v2 = vadd.f32 %v484_v1, %v334_v62  ;;  %v1846_v3 = vpop.f32.mrb[3].mxu1 }
 0x172   : > { %v650_v4 = vpop.f32.mrb[4].mxu1 }
 0x173   : > { %v656_v5 = vadd.f32 %v650_v4, %v485_v2  ;;  %v1851_v6 = vpop.f32.mrb[5].mxu1 }
 0x176   : > { %v819_v7 = vpop.f32.mrb[6].mxu1 }
 0x177   : > { %v825_v8 = vadd.f32 %v819_v7, %v656_v5  ;;  %v1856_v9 = vpop.f32.mrb[7].mxu1 }
 0x17a   : > { %v988_v10 = vpop.f32.mrb[8].mxu1 }
 0x17b   : > { %v994_v11 = vadd.f32 %v988_v10, %v825_v8  ;;  %v1861_v12 = vpop.f32.mrb[9].mxu1 }
 0x17e   : > { %v1157_v13 = vpop.f32.mrb[10].mxu1 }
 0x17f   : > { %v1163_v14 = vadd.f32 %v1157_v13, %v994_v11  ;;  %v1866_v0 = vpop.f32.mrb[11].mxu1 }
 0x185   : > { %v1326_v15 = vpop.f32.mrb[12].mxu1 }
 0x186   : > { %v1332_v16 = vadd.f32 %v1326_v15, %v1163_v14  ;;  %v1871_v17 = vpop.f32.mrb[13].mxu1 }
 0x189   : > { %v1495_v18 = vpop.f32.mrb[14].mxu1 }
 0x18a   : > { %v1501_v19 = vadd.f32 %v1495_v18, %v1332_v16  ;;  %v1876_v20 = vpop.f32.mrb[15].mxu1 }
 0x190   : > { %v1664_v21 = vpop.f32.mrb[16].mxu1 }
 0x191   : > { %v1670_v23 = vadd.f32 %v1664_v21, %v1501_v19  ;;  %v1881_v24 = vpop.f32.mrb[17].mxu1 }
 0x193   : > { %v1679_v25 = vadd.f32 %v1675_v22, %v1670_v23 }
 0x195   : > { %1683 = vst.msk [vmem:[%s163_s20 + $0x10] sm:$0xff] %vm1682_vm11, %v1679_v25 }
 0x1aa   : > { %v1593_v26 = vpop.f32.mrb[0].mxu0 }
 0x1ab   : > { %v1677_v27 = vadd.f32 %v1675_v22, %v1593_v26  ;;  %v1595_v28 = vpop.f32.mrb[1].mxu0 }
 0x1ac   : > { %v1678_v29 = vadd.f32 %v1675_v22, %v1595_v28 }
 0x1ad   : > { %1680 = vst [vmem:[%s163_s20] sm:$0xff] %v1677_v27 }
 0x1ae   : > { %1681 = vst [vmem:[%s163_s20 + $0x8] sm:$0xff] %v1678_v29 }
 0x1af   : > { %1966 = shalt.err (!%p1963_p3)
}
 0x1b0   : > { %s1967_s6 = scalar_lea.hbm %s2256_s28, 384  ;;  %s1971_s9 = scalar_lea.hbm %s2301_s3, 768 }
 0x1b1   : > { %p1968_p4 = scmp.ne.s32.totalorder %s2256_s28, %s1967_s6  ;;  %p1972_p9 = scmp.lt.u32.totalorder %s2256_s28, %s2301_s3 }
 0x1b2   : > { %p1973_p10 = scmp.lt.u32.totalorder %s1971_s9, %s1967_s6  ;;  %p1975_p12 = scmp.lt.u32.totalorder %s1967_s6, %s2256_s28 }
 0x1b3   : > { %p1969_p7 = pnand %p1968_p4, %p2087_p5 }
 0x1b4   : > { %p1974_p11 = por %p1973_p10, %p1972_p9 }
 0x1b5   : > { %p1970_p8 = pneg %p1969_p7 }
 0x1b6   : > { %p1976_p13 = por %p1975_p12, %p1974_p11 }
 0x1b8   : > { %p1977_p0 = pnand %p1976_p13, %p1970_p8 }
 0x1ba   : > { %1980 = shalt.err (!%p1977_p0)
}
 0x1bb   : > { %1901 = dma.vmem_to_hbm [thread:$0]  (%p2087_p5), %s2258_s25, 384, %s2256_s28, %s1685_s29  }
 0x1bc PF: > { %p1907_p1 = scmp.ge.s32.totalorder %s2015_s15, 2  ;;  %s1711_s17 = sand.u32 1, %s2003_s12  }
 0x1bd   : > { %s1712_s19 = scalar_lea.sflag [#allocation3], %s1711_s17 }
 0x1be   : > { %p1904_p2 = pnand %p1907_p1, %p2091_p6 }
 0x1c0   : > { %1998 = dma.done.wait (!%p1904_p2), %s1712_s19, 384  }
 0x1c1   : > { %2000 = vsyncadd (!%p1904_p2), %s1712_s19, 4294966912  ;;  %p13_p3 = scmp.ge.s32.totalorder %s2074_s18, 4   ;;  %s2304_s12 = smov %s2007_s13 }
 0x1c2   : > { %s2305_s13 = smov %s2011_s14  ;;  %s2306_s14 = smov %s2085_s21 }
 0x1c3   : > { %s2307_s15 = smov %s2074_s18  ;;  %15 = sbr.rel (!%p13_p3) target bundleno = 3 (0x3), region = 75 }
 0x1ca   :  { %1717 = vsyncpa [#allocation3], 1 }
 0x1cb   :  { %1719 = vsyncpa [#allocation3 + $0x1], 1 }

</bundles_post_ra>
